<compile_context>
chip_gen: v7x
topology: tpu7x:2x2x1
jax: 0.10.0
libtpu: 0.0.40
codegen_flags: <defaults>
</compile_context>

<pallas_src>
import functools
import math

import jax
import jax.numpy as jnp
import numpy as np
from jax import lax
from jax.experimental import pallas as pl
from jax.experimental.pallas import tpu as pltpu


# ----------------------------------------------------------------------------
# Kernel: one grid step processes a (TM, 2B) block of rows of the logits matrix.
# ----------------------------------------------------------------------------
def _ntxent_row_block_kernel(prep_ref, o_ref, *, batch_size, inv_temperature,
                             use_cosine, block_rows):
    """prep_ref : (N, Z) bf16  prepared reps (normalized if cosine, * 1/sqrt(T)),
                  resident in VMEM for the whole grid (constant index_map).
       o_ref    : (TM, 1) f32  per-row loss  lse_{j!=i}(logits) - logits[i, pos(i)].
    """
    B = batch_size
    N = 2 * B
    TM = block_rows
    i = pl.program_id(0)

    # Keys: full prepared matrix (one DMA for the whole grid, already in VMEM).
    k = prep_ref[...]                                           # (N, Z) bf16
    # Queries: current row block sliced out of the same resident buffer.
    start = pl.multiple_of(i * TM, TM)
    q = prep_ref[pl.ds(start, TM), :]                           # (TM, Z) bf16

    # 1/T is already folded into BOTH operands as 1/sqrt(T), so the MXU output
    # IS the logits block:  (q/sqrt(T)) . (k/sqrt(T))^T = sim / T.
    # NT contraction on the MXU, bf16 inputs, f32 accumulation.
    logits = lax.dot_general(q, k, (((1,), (1,)), ((), ())),
                             preferred_element_type=jnp.float32)  # (TM, N) f32

    # Lightweight index bookkeeping: one (1, N) lane iota + (TM, 1) row vectors;
    # the comparisons broadcast to (TM, N) without materializing int32 planes.
    col = lax.broadcasted_iota(jnp.int32, (1, N), 1)              # (1, N)
    row = lax.broadcasted_iota(jnp.int32, (TM, 1), 0) + i * TM    # (TM, 1) global row
    pos_col = row + B
    pos_col = jnp.where(pos_col >= N, pos_col - N, pos_col)       # (row + B) mod N

    # Positive logit per row (the +/-B shifted diagonal).
    pos = jnp.sum(jnp.where(col == pos_col, logits, 0.0),
                  axis=-1, keepdims=True)                         # (TM, 1)

    # log-sum-exp over all columns j != i (self-similarity excluded exactly).
    masked = jnp.where(col == row, jnp.float32(-1e30), logits)
    if use_cosine:
        # Cosine logits are bounded by 1/T -> use it as the LSE max; skips the
        # per-row XLU max reduce. Masked self column underflows to exp(...) == 0.
        m = jnp.float32(inv_temperature)
    else:
        m = jnp.max(masked, axis=-1, keepdims=True)               # (TM, 1)
    lse = m + jnp.log(jnp.sum(jnp.exp(masked - m), axis=-1, keepdims=True))

    # Per-row CrossEntropy(label=0); independent per block -> "parallel" grid axis.
    o_ref[...] = lse - pos


# ----------------------------------------------------------------------------
# Wrapper
# ----------------------------------------------------------------------------
def ntxent_loss(zis, zjs, *, temperature, use_cosine_similarity, block_rows=128):
    """NTXentLoss.forward(zis, zjs). zis/zjs: (B, Z). Returns scalar f32 loss."""
    B, Z = zis.shape
    assert zjs.shape == (B, Z)
    N = 2 * B

    # Matches torch.cat([zjs, zis], dim=0).
    reps = jnp.concatenate([zjs, zis], axis=0).astype(jnp.float32)       # (N, Z)

    # One-time O(N*Z) preparation (hoisted out of the per-step grid path, and it
    # keeps the row-block axis dependency-free so it can run "parallel" on v7x):
    #   cosine -> row-normalize once;  both paths -> fold 1/sqrt(T) so the MXU
    #   output is the logits directly;  cast bf16 to feed the MXU natively.
    if use_cosine_similarity:
        sq = jnp.sum(reps * reps, axis=-1, keepdims=True)
        reps = reps * lax.rsqrt(jnp.maximum(sq, jnp.float32(1e-16)))
    prep = (reps * jnp.float32(1.0 / math.sqrt(float(temperature)))
            ).astype(jnp.bfloat16)                                       # (N, Z) bf16

    # Row-block size: a multiple of 8 that divides N (so the (TM, 1) output block is
    # layout-legal); otherwise fall back to a single full-size block.
    TM = N
    for cand in (block_rows, 512, 256, 128, 64, 32, 16, 8):
        if cand % 8 == 0 and 0 < cand <= N and N % cand == 0:
            TM = cand
            break
    grid = (N // TM,)

    kernel = functools.partial(
        _ntxent_row_block_kernel,
        batch_size=B,
        inv_temperature=float(1.0 / float(temperature)),
        use_cosine=bool(use_cosine_similarity),
        block_rows=TM,
    )

    # Advisory cost + a shape-derived scoped-VMEM limit (defaults are 16/32 MiB).
    cost = pl.CostEstimate(
        flops=2 * N * N * Z + 8 * N * N,
        transcendentals=N * N + N,
        bytes_accessed=N * Z * 2 + N * 4,
    )
    vmem_est = (2 * N * Z * 2        # double-buffered resident bf16 reps
                + 2 * TM * 4         # output row blocks
                + 8 * TM * N * 4)    # logits / mask / exp temporaries headroom
    vmem_limit = int(min(max(vmem_est + (2 << 20), 32 << 20), 64 << 20))

    per_row = pl.pallas_call(
        kernel,
        out_shape=jax.ShapeDtypeStruct((N, 1), jnp.float32),
        grid_spec=pltpu.PrefetchScalarGridSpec(
            num_scalar_prefetch=0,
            grid=grid,
            in_specs=[
                # Whole (N, Z) prepared matrix, constant index map -> DMA'd once.
                pl.BlockSpec((N, Z), lambda i: (0, 0)),
            ],
            out_specs=pl.BlockSpec((TM, 1), lambda i: (i, 0)),
        ),
        compiler_params=pltpu.CompilerParams(
            dimension_semantics=("parallel",),   # independent row blocks (2 TCs on v7x)
            vmem_limit_bytes=vmem_limit),
        cost_estimate=cost,
    )(prep)

    return jnp.sum(per_row) * jnp.float32(1.0 / N)


# ----------------------------------------------------------------------------
# NumPy reference: literal translation of the PyTorch module (float64)
# ----------------------------------------------------------------------------
def reference_ntxent(zis, zjs, temperature, use_cosine_similarity):
    zis = np.asarray(zis, np.float64)
    zjs = np.asarray(zjs, np.float64)
    B = zis.shape[0]
    N = 2 * B
    reps = np.concatenate([zjs, zis], axis=0)
    if use_cosine_similarity:
        norms = np.linalg.norm(reps, axis=-1, keepdims=True)
        sim = (reps @ reps.T) / np.maximum(norms @ norms.T, 1e-8)
    else:
        sim = reps @ reps.T
    l_pos = np.diag(sim, B)
    r_pos = np.diag(sim, -B)
    positives = np.concatenate([l_pos, r_pos]).reshape(N, 1)
    mask = (1 - (np.eye(N) + np.eye(N, k=B) + np.eye(N, k=-B))).astype(bool)
    negatives = sim[mask].reshape(N, -1)
    logits = np.concatenate([positives, negatives], axis=1) / temperature
    # CrossEntropyLoss(reduction='sum') with all labels == 0.
    m = logits.max(axis=1, keepdims=True)
    lse = m[:, 0] + np.log(np.exp(logits - m).sum(axis=1))
    loss = np.sum(lse - logits[:, 0])
    return loss / N


if __name__ == "__main__":
    key = jax.random.PRNGKey(0)
    k_i, k_j = jax.random.split(key)

    batch_size, z_dim = 128, 128      # N = 2B = 256 rows, lane-dense
    temperature = 0.5
    zis = jax.random.normal(k_i, (batch_size, z_dim), jnp.float32)
    zjs = jax.random.normal(k_j, (batch_size, z_dim), jnp.float32)

    for use_cos in (True, False):
        loss = jax.block_until_ready(
            ntxent_loss(zis, zjs, temperature=temperature,
                        use_cosine_similarity=use_cos))
        ref = reference_ntxent(zis, zjs, temperature, use_cos)
        assert np.isfinite(float(loss))
        # bf16 MXU inputs with f32 accumulation: loosened (but still tight) tolerance.
        tol = 5e-3 + 1e-2 * abs(float(ref))
        assert abs(float(loss) - float(ref)) < tol, (use_cos, float(loss), float(ref))

    print("KERNEL_OK")
</pallas_src>

<mosaic_0001>
module attributes {stable_mosaic.version = 11 : i64} {
  func.func @_ntxent_row_block_kernel(%arg0: i32, %arg1: memref<256x128xbf16, #tpu.memory_space<vmem>>, %arg2: memref<128x1xf32, #tpu.memory_space<vmem>>) attributes {dimension_semantics = [#tpu.dimension_semantics<parallel>], iteration_bounds = array<i64: 2>, scalar_prefetch = 0 : i64, scratch_operands = 0 : i64, tpu.core_type = #tpu.core_type<tc>, window_params = [{pipeline_mode = #tpu.pipeline_mode<synchronous>, transform_indices = @transform_0, window_bounds = array<i64: 256, 128>}, {transform_indices = @transform_1, window_bounds = array<i64: 128, 1>}]} {
    %c0 = arith.constant 0 : index
    %c0_0 = arith.constant 0 : index
    %0 = vector.load %arg1[%c0, %c0_0] : memref<256x128xbf16, #tpu.memory_space<vmem>>, vector<256x128xbf16>
    %c128_i32 = arith.constant 128 : i32
    %1 = arith.muli %arg0, %c128_i32 : i32
    %2 = tpu.assume_multiple %1, 128 : i32
    %3 = arith.index_cast %2 : i32 to index
    %c0_1 = arith.constant 0 : index
    %4 = vector.load %arg1[%3, %c0_1] : memref<256x128xbf16, #tpu.memory_space<vmem>>, vector<128x128xbf16>
    %cst = arith.constant dense<0.000000e+00> : vector<128x256xf32>
    %5 = tpu.matmul %4, %0, %cst {dimension_numbers = #tpu.dot_dimension_numbers<[1], [1], [0], [0], [0, 0, 1, 0], [], []>} : vector<128x128xbf16>, vector<256x128xbf16>, vector<128x256xf32> -> vector<128x256xf32>
    %6 = tpu.iota {dimensions = array<i32: 1>} : vector<1x256xi32>
    %7 = tpu.iota {dimensions = array<i32: 0>} : vector<128x1xi32>
    %c128_i32_2 = arith.constant 128 : i32
    %8 = arith.muli %arg0, %c128_i32_2 : i32
    %9 = vector.broadcast %8 : i32 to vector<128x1xi32>
    %10 = arith.addi %7, %9 : vector<128x1xi32>
    %c128_i32_3 = arith.constant 128 : i32
    %11 = vector.broadcast %c128_i32_3 : i32 to vector<128x1xi32>
    %12 = arith.addi %10, %11 : vector<128x1xi32>
    %c256_i32 = arith.constant 256 : i32
    %13 = vector.broadcast %c256_i32 : i32 to vector<128x1xi32>
    %14 = arith.cmpi sge, %12, %13 : vector<128x1xi32>
    %c256_i32_4 = arith.constant 256 : i32
    %15 = vector.broadcast %c256_i32_4 : i32 to vector<128x1xi32>
    %16 = arith.subi %12, %15 : vector<128x1xi32>
    %17 = arith.select %14, %16, %12 : vector<128x1xi1>, vector<128x1xi32>
    %18 = vector.broadcast %6 : vector<1x256xi32> to vector<128x256xi32>
    %19 = vector.broadcast %17 : vector<128x1xi32> to vector<128x256xi32>
    %20 = arith.cmpi eq, %18, %19 : vector<128x256xi32>
    %cst_5 = arith.constant 0.000000e+00 : f32
    %21 = vector.broadcast %cst_5 : f32 to vector<128x256xf32>
    %22 = arith.select %20, %5, %21 : vector<128x256xi1>, vector<128x256xf32>
    %cst_6 = arith.constant dense<0.000000e+00> : vector<128xf32>
    %23 = vector.multi_reduction <add>, %22, %cst_6 [1] : vector<128x256xf32> to vector<128xf32>
    %24 = vector.shape_cast %23 : vector<128xf32> to vector<128x1xf32>
    %25 = vector.broadcast %6 : vector<1x256xi32> to vector<128x256xi32>
    %26 = vector.broadcast %10 : vector<128x1xi32> to vector<128x256xi32>
    %27 = arith.cmpi eq, %25, %26 : vector<128x256xi32>
    %cst_7 = arith.constant -1.000000e+30 : f32
    %28 = vector.broadcast %cst_7 : f32 to vector<128x256xf32>
    %29 = arith.select %27, %28, %5 : vector<128x256xi1>, vector<128x256xf32>
    %cst_8 = arith.constant 2.000000e+00 : f32
    %30 = vector.broadcast %cst_8 : f32 to vector<128x256xf32>
    %31 = arith.subf %29, %30 : vector<128x256xf32>
    %32 = math.exp %31 : vector<128x256xf32>
    %cst_9 = arith.constant dense<0.000000e+00> : vector<128xf32>
    %33 = vector.multi_reduction <add>, %32, %cst_9 [1] : vector<128x256xf32> to vector<128xf32>
    %34 = vector.shape_cast %33 : vector<128xf32> to vector<128x1xf32>
    %35 = math.log %34 : vector<128x1xf32>
    %cst_10 = arith.constant 2.000000e+00 : f32
    %36 = vector.broadcast %cst_10 : f32 to vector<128x1xf32>
    %37 = arith.addf %36, %35 : vector<128x1xf32>
    %38 = arith.subf %37, %24 : vector<128x1xf32>
    %c0_11 = arith.constant 0 : index
    %c0_12 = arith.constant 0 : index
    %39 = vector.load %arg2[%c0_11, %c0_12] : memref<128x1xf32, #tpu.memory_space<vmem>>, vector<128x1xf32>
    tpu.vector_store %arg2[%c0_11, %c0_12], %38 {strides = array<i32>} : memref<128x1xf32, #tpu.memory_space<vmem>>, vector<128x1xf32>,
    return
  }
  func.func @transform_0(%arg0: i32) -> (i32, i32) {
    %c0_i32 = arith.constant 0 : i32
    %c0_i32_0 = arith.constant 0 : i32
    %c0_i32_1 = arith.constant 0 : i32
    return %c0_i32, %c0_i32_0 : i32, i32
  }
  func.func @transform_1(%arg0: i32) -> (i32, i32) {
    %c0_i32 = arith.constant 0 : i32
    %c0_i32_0 = arith.constant 0 : i32
    return %arg0, %c0_i32 : i32, i32
  }
}

</mosaic_0001>

<bundles_post_ra>
// kernel: tpu_custom_call.1
= control target key start
LH: loop header
LB: loop body
LE: loop exit
PB: predicated region body
PF: predicated region fallthrough
CT: control target
= control target key end

     0   :  { %6 = vsyncpa [#allocation3], 0  ;;  %s1310_s6 = smov 0   ;;  %s1949_s0 = inlined_call_operand.hbm [shape: bf16[256,128], index: 0, kind: input, shape index: {}]   ;;  %s1950_s1 = inlined_call_operand.vmem [shape: f32[256,1], index: 1, kind: output, shape index: {}]  }
   0x1 LB: > { %s1316_s7 = sadd.s32 4294967295, %s1295_s6   ;;  %p986_p0 = scmp.ge.s32.totalorder %s1295_s6, 1  ;;  %s1295_s6 = sphi %s1310_s6, %s12_s6  }
   0x2   : > { %p64_p1 = scmp.lt.s32.totalorder %s1295_s6, 3  ;;  %s1297_s8 = smov [#allocation2]  }
   0x3   : > { %s76_s9 = sshll.u32 %s1297_s8, 4  ;;  %p1951_p3 = scmp.eq.s32.totalorder %s1316_s7, 0  ;;  %s77_s9 = int_to_ptr.vmem [resolvable:$true] %s76_s9 }
   0x4   : > { %p1320_p2 = pnand %p986_p0, %p64_p1  ;;  %s1257_s14 = scalar_lea.hbm %s1949_s0, 2048 }
   0x5   : > { %p1258_p6 = scmp.ne.s32.totalorder %s1949_s0, %s1257_s14  ;;  %p1264_p10 = scmp.lt.u32.totalorder %s1257_s14, %s1949_s0 }
   0x6   : > { %s1953_s10 = scalar_select %p1320_p2, 1, 0 }
   0x7   : > { %p1120_p4 = pneg %p1320_p2 }
   0x9   : > { %p1329_p5 = pnand %p1951_p3, %p1120_p4 }
   0xb   : > { %p1259_p7 = pneg %p1329_p5 }
   0xd   : > { %p1260_p8 = pnand %p1259_p7, %p1258_p6 }
   0xf   : > { %p1261_p9 = pneg %p1260_p8 }
  0x11   : > { %p1266_p11 = pnand %p1264_p10, %p1261_p9 }
  0x13   : > { %1269 = shalt.err (!%p1266_p11)
}
  0x14   : > { %s1270_s19 = scalar_lea.vmem %s77_s9, 2048  ;;  %p1278_p1 = scmp.lt.s32.totalorder %s77_s9, %s77_s9 }
  0x15   : > { %p1271_p12 = scmp.ne.s32.totalorder %s77_s9, %s1270_s19  ;;  %p1279_p4 = scmp.lt.s32.totalorder %s1270_s19, %s1270_s19 }
  0x17   : > { %p1273_p13 = pnand %p1271_p12, %p1259_p7  ;;  %p1280_p3 = por %p1279_p4, %p1278_p1 }
  0x19   : > { %p1274_p0 = pneg %p1273_p13 }
  0x1b   : > { %p1281_p2 = pnand %p1280_p3, %p1274_p0 }
  0x1d   : > { %1284 = shalt.err (!%p1281_p2)
}
  0x1e   : > { %s1298_s20 = smov 64   ;;  %s1299_s21 = smov 4  }
  0x1f   : > { %1123 = dma.hbm_to_vmem [thread:$0]  (!%p1329_p5), %s1949_s0, 2048, %s77_s9, [#allocation3], %s1298_s20, %s1298_s20, %s1299_s21  }
  0x20   : > { %p1955_p6 = scmp.ne.s32.totalorder %s1953_s10, 0 }
  0x21   : > { %p1956_p8 = scmp.eq.s32.totalorder (!%p1955_p6), %s1316_s7, 0 }
  0x22   : > { %92 = sbr.rel (%p1955_p6) target bundleno = 556 (0x22c), region = 24 }
  0x29   : > { %1290 = dma.done.wait (%p1956_p8), [#allocation3], 2048   ;;  %p1957_p7 = pmov %p1956_p8 }
  0x2a   : > { %v1137_v0 = vld [vmem:[#allocation2 + $0x40] sm:$0xff]   ;;  %v1139_v2 = vld [vmem:[#allocation2 + $0x48] sm:$0xff]   ;;  %s992_s24 = sshll.u32 %s1316_s7, 7  ;;  %v1141_v4 = vld [vmem:[#allocation2 + $0x50] sm:$0xff]   ;;  %v424_v24 = vlaneseq  ;;  %s990_s28 = sshll.u32 %s1316_s7, 4 }
  0x2b   : > { %1292 = vsyncadd (%p1957_p7), [#allocation3], 4294965248  ;;  %v1138_v1 = vld [vmem:[#allocation2] sm:$0xff]   ;;  %1068 = vmatprep.subr.bf16.mxu0 %v1137_v0  ;;  %1100 = vmatprep.subr.bf16.mxu1 %v1137_v0  ;;  %v1140_v3 = vld [vmem:[#allocation2 + $0x8] sm:$0xff]   ;;  %s147_s25 = sshra.s32 %s992_s24, 3  ;;  %v1374_v28 = vstv %s992_s24  ;;  %p108_p2 = scmp.lt.s32.totalorder %s990_s28, 31 }
  0x2c   : > { %1069 = vmatpush3.bf16.xpose.msra.mxu0 %v1138_v1  ;;  %1108 = vmatpush3.bf16.xpose.msra.mxu1 %v1138_v1  ;;  %s993_s26 = sshll.u32 %s147_s25, 2  ;;  %v1142_v5 = vld [vmem:[#allocation2 + $0x10] sm:$0xff]   ;;  %v1143_v6 = vld [vmem:[#allocation2 + $0x58] sm:$0xff]   ;;  %v1145_v10 = vld [vmem:[#allocation2 + $0x60] sm:$0xff]   ;;  %v1368_v25 = vshrl.u32 %v424_v24, 7  ;;  %v1382_v31 = vand.u32 127, %v424_v24 }
  0x2d   : > { %1070 = vmatprep.subr.bf16.mxu0 %v1139_v2  ;;  %1101 = vmatprep.subr.bf16.mxu1 %v1139_v2  ;;  %s1358_s27 = scalar_lea.vmem [#allocation2], %s993_s26  ;;  %v1144_v9 = vld [vmem:[#allocation2 + $0x18] sm:$0xff]   ;;  %v1146_v11 = vld [vmem:[#allocation2 + $0x20] sm:$0xff]   ;;  %v1147_v12 = vld [vmem:[#allocation2 + $0x68] sm:$0xff]   ;;  %s1978_s28 = smov (!%p108_p2, %s990_s28), 31 }
  0x2e   : > { %v1153_v7 = vld [vmem:[%s1358_s27] sm:$0xff]   ;;  %v1148_v13 = vld [vmem:[#allocation2 + $0x28] sm:$0xff]   ;;  %v1149_v14 = vld [vmem:[#allocation2 + $0x70] sm:$0xff]   ;;  %v438_v26 = vadd.s32 80, %v1368_v25  ;;  %v439_v27 = vadd.s32 88, %v1368_v25  ;;  %v1387_v36 = vadd.s32 128, %v1382_v31  ;;  %v1456_v2 = vadd.s32 %v1374_v28, %v1368_v25 }
  0x2f   : > { %v1154_v8 = vld [vmem:[%s1358_s27 + $0x20] sm:$0xff]   ;;  %1084 = vmatprep.mubr.bf16.mxu0 %v1153_v7  ;;  %v1150_v15 = vld [vmem:[#allocation2 + $0x30] sm:$0xff]   ;;  %v1151_v16 = vld [vmem:[#allocation2 + $0x78] sm:$0xff]   ;;  %v440_v39 = vadd.s32 96, %v1368_v25  ;;  %v441_v40 = vadd.s32 104, %v1368_v25  ;;  %v442_v49 = vadd.s32 112, %v1368_v25 }
  0x30   : > { %1092 = vmatprep.mubr.bf16.mxu1 %v1154_v8  ;;  %v1152_v17 = vld [vmem:[#allocation2 + $0x38] sm:$0xff]   ;;  %v1155_v18 = vld [vmem:[%s1358_s27 + $0x8] sm:$0xff]   ;;  %v1157_v20 = vld [vmem:[%s1358_s27 + $0x10] sm:$0xff]   ;;  %v1377_v29 = vadd.s32 %v1374_v28, %v438_v26  ;;  %v1380_v30 = vadd.s32 %v1374_v28, %v439_v27  ;;  %v443_v51 = vadd.s32 120, %v1368_v25  ;;  %v436_v59 = vadd.s32 64, %v1368_v25  ;;  %s991_s29 = sshll.u32 %s1978_s28, 3 }
  0x31   : > { %v1156_v19 = vld [vmem:[%s1358_s27 + $0x28] sm:$0xff]   ;;  %v1158_v21 = vld [vmem:[%s1358_s27 + $0x30] sm:$0xff]   ;;  %v1159_v22 = vld [vmem:[%s1358_s27 + $0x18] sm:$0xff]   ;;  %v1402_v41 = vadd.s32 %v1374_v28, %v440_v39  ;;  %v1405_v42 = vadd.s32 %v1374_v28, %v441_v40  ;;  %v1423_v50 = vadd.s32 %v1374_v28, %v442_v49  ;;  %v437_v61 = vadd.s32 72, %v1368_v25  ;;  %s1904_s3 = scalar_lea.vmem %s1950_s1, %s991_s29 }
  0x32   : > { %v1160_v23 = vld [vmem:[%s1358_s27 + $0x38] sm:$0xff]   ;;  %v471_v32 = vadd.s32 128, %v1377_v29  ;;  %v472_v33 = vadd.s32 128, %v1380_v30  ;;  %v1428_v53 = vadd.s32 %v1374_v28, %v443_v51  ;;  %v1445_v60 = vadd.s32 %v1374_v28, %v436_v59 }
  0x33   : > { %v473_v43 = vadd.s32 128, %v1402_v41  ;;  %v474_v44 = vadd.s32 128, %v1405_v42  ;;  %v475_v52 = vadd.s32 128, %v1423_v50  ;;  %v1450_v63 = vadd.s32 %v1374_v28, %v437_v61 }
  0x34   : > { %1071 = vmatpush3.bf16.xpose.msra.mxu0 %v1140_v3  ;;  %1109 = vmatpush3.bf16.xpose.msra.mxu1 %v1140_v3  ;;  %vm487_vm0 = vcmp.ge.s32.totalorder %v471_v32, 256  ;;  %v1028_v34 = vadd.s32 4294967040, %v471_v32  ;;  %vm488_vm1 = vcmp.ge.s32.totalorder %v472_v33, 256  ;;  %v1029_v35 = vadd.s32 4294967040, %v472_v33 }
  0x35   : > { %1072 = vmatprep.subr.bf16.mxu0 %v1141_v4  ;;  %1102 = vmatprep.subr.bf16.mxu1 %v1141_v4  ;;  %vm489_vm5 = vcmp.ge.s32.totalorder %v473_v43, 256  ;;  %v1030_v45 = vadd.s32 4294967040, %v473_v43  ;;  %vm490_vm6 = vcmp.ge.s32.totalorder %v474_v44, 256  ;;  %v1031_v46 = vadd.s32 4294967040, %v474_v44 }
  0x36   : > { %v1389_v37 = vsel %vm487_vm0, %v1028_v34, %v471_v32  ;;  %v1393_v38 = vsel %vm488_vm1, %v1029_v35, %v472_v33  ;;  %vm491_vm11 = vcmp.ge.s32.totalorder %v475_v52, 256  ;;  %v1032_v54 = vadd.s32 4294967040, %v475_v52 }
  0x37   : > { %v1409_v47 = vsel %vm489_vm5, %v1030_v45, %v473_v43  ;;  %v1411_v48 = vsel %vm490_vm6, %v1031_v46, %v474_v44  ;;  %v476_v55 = vadd.s32 128, %v1428_v53  ;;  %v469_v62 = vadd.s32 128, %v1445_v60 }
  0x38   : > { %v1431_v56 = vsel %vm491_vm11, %v1032_v54, %v475_v52  ;;  %v429_v0 = vadd.s32 8, %v1368_v25  ;;  %v430_v1 = vadd.s32 16, %v1368_v25  ;;  %v470_v4 = vadd.s32 128, %v1450_v63 }
  0x39   : > { %vm492_vm12 = vcmp.ge.s32.totalorder %v476_v55, 256  ;;  %v1033_v57 = vadd.s32 4294967040, %v476_v55  ;;  %v1026_v3 = vadd.s32 4294967040, %v469_v62  ;;  %vm485_vm1 = vcmp.ge.s32.totalorder %v469_v62, 256 }
  0x3a   : > { %vm486_vm5 = vcmp.ge.s32.totalorder %v470_v4, 256  ;;  %vm637_vm6 = vcmp.eq.s32.totalorder %v1382_v31, %v1456_v2  ;;  %vm638_vm0 = vcmp.eq.s32.totalorder %v1387_v36, %v1456_v2  ;;  %vm654_vm14 = vcmp.eq.s32.totalorder %v1387_v36, %v1445_v60 }
  0x3b   : > { %v1437_v58 = vsel %vm492_vm12, %v1033_v57, %v476_v55  ;;  %vm653_vm12 = vcmp.eq.s32.totalorder %v1382_v31, %v1445_v60 }
  0x3c   : > { %1073 = vmatpush3.bf16.xpose.msra.mxu0 %v1142_v5  ;;  %1110 = vmatpush3.bf16.xpose.msra.mxu1 %v1142_v5  ;;  %v431_v5 = vadd.s32 24, %v1368_v25 }
  0x3d   : > { %1074 = vmatprep.subr.bf16.mxu0 %v1143_v6  ;;  %1103 = vmatprep.subr.bf16.mxu1 %v1143_v6  ;;  %v1461_v6 = vadd.s32 %v1374_v28, %v429_v0 }
  0x44   : > { %1075 = vmatpush3.bf16.xpose.msra.mxu0 %v1144_v9  ;;  %1111 = vmatpush3.bf16.xpose.msra.mxu1 %v1144_v9  ;;  %v1466_v9 = vadd.s32 %v1374_v28, %v430_v1 }
  0x45   : > { %1076 = vmatprep.subr.bf16.mxu0 %v1145_v10  ;;  %1104 = vmatprep.subr.bf16.mxu1 %v1145_v10  ;;  %v434_v10 = vadd.s32 48, %v1368_v25 }
  0x46   : > { %vm641_vm8 = vcmp.eq.s32.totalorder %v1382_v31, %v1466_v9 }
  0x4c   : > { %1077 = vmatpush3.bf16.xpose.msra.mxu0 %v1146_v11  ;;  %1112 = vmatpush3.bf16.xpose.msra.mxu1 %v1146_v11  ;;  %v435_v11 = vadd.s32 56, %v1368_v25 }
  0x4d   : > { %1078 = vmatprep.subr.bf16.mxu0 %v1147_v12  ;;  %1105 = vmatprep.subr.bf16.mxu1 %v1147_v12  ;;  %v1470_v12 = vsel %vm485_vm1, %v1026_v3, %v469_v62 }
  0x4e   : > { %vm541_vm11 = vcmp.eq.s32.totalorder %v1382_v31, %v1470_v12 }
  0x54   : > { %1079 = vmatpush3.bf16.xpose.msra.mxu0 %v1148_v13  ;;  %1113 = vmatpush3.bf16.xpose.msra.mxu1 %v1148_v13  ;;  %v1027_v13 = vadd.s32 4294967040, %v470_v4 }
  0x55   : > { %1080 = vmatprep.subr.bf16.mxu0 %v1149_v14  ;;  %1106 = vmatprep.subr.bf16.mxu1 %v1149_v14  ;;  %v461_v14 = vadd.s32 128, %v1456_v2 }
  0x57   : > { %vm477_vm1 = vcmp.ge.s32.totalorder %v461_v14, 256 }
  0x5c   : > { %1081 = vmatpush3.bf16.xpose.msra.mxu0 %v1150_v15  ;;  %1114 = vmatpush3.bf16.xpose.msra.mxu1 %v1150_v15  ;;  %v1474_v15 = vadd.s32 %v1374_v28, %v431_v5 }
  0x5d   : > { %1082 = vmatprep.subr.bf16.mxu0 %v1151_v16  ;;  %1107 = vmatprep.subr.bf16.mxu1 %v1151_v16  ;;  %v462_v16 = vadd.s32 128, %v1461_v6 }
  0x5e   : > { %v464_v24 = vadd.s32 128, %v1474_v15 }
  0x5f   : > { %vm478_vm15 = vcmp.ge.s32.totalorder %v462_v16, 256 }
  0x60   : > { %v1021_v35 = vadd.s32 4294967040, %v464_v24  ;;  %vm480_vm3 = vcmp.ge.s32.totalorder %v464_v24, 256 }
  0x62   : > { %v1531_v49 = vsel %vm480_vm3, %v1021_v35, %v464_v24 }
  0x64   : > { %1083 = vmatpush3.bf16.xpose.msra.mxu0 %v1152_v17  ;;  %1115 = vmatpush3.bf16.xpose.msra.mxu1 %v1152_v17 }
  0x6b   : > { %1085 = vmatmul.mubr.bf16.vlgmr.msra.gmra.mrb[0].mxu0 %v1153_v7  ;;  %1093 = vmatmul.mubr.bf16.vlgmr.msra.gmra.mrb[0].mxu1 %v1154_v8  ;;  %v432_v7 = vadd.s32 32, %v1368_v25  ;;  %v433_v8 = vadd.s32 40, %v1368_v25  ;;  %v1019_v25 = vadd.s32 4294967040, %v462_v16 }
  0x6c   : > { %1086 = vmatprep.mubr.bf16.mxu0 %v1155_v18  ;;  %1094 = vmatprep.mubr.bf16.mxu1 %v1156_v19 }
  0x6d   : > { %v1478_v17 = vadd.s32 %v1374_v28, %v432_v7  ;;  %v1519_v39 = vsel %vm478_vm15, %v1019_v25, %v462_v16 }
  0x6e   : > { %vm527_vm15 = vcmp.eq.s32.totalorder %v1382_v31, %v1519_v39  ;;  %vm528_vm4 = vcmp.eq.s32.totalorder %v1387_v36, %v1519_v39 }
  0x6f   : > { %v465_v26 = vadd.s32 128, %v1478_v17 }
  0x71   : > { %v1022_v40 = vadd.s32 4294967040, %v465_v26 }
  0x73   : > { %1087 = vmatmul.mubr.bf16.gmra.mrb[4].mxu0 %v1155_v18  ;;  %1095 = vmatmul.mubr.bf16.gmra.mrb[4].mxu1 %v1156_v19  ;;  %v1481_v18 = vadd.s32 %v1374_v28, %v433_v8  ;;  %v463_v19 = vadd.s32 128, %v1466_v9 }
  0x74   : > { %1088 = vmatprep.mubr.bf16.mxu0 %v1157_v20  ;;  %1096 = vmatprep.mubr.bf16.mxu1 %v1158_v21 }
  0x75   : > { %v466_v27 = vadd.s32 128, %v1481_v18  ;;  %vm479_vm13 = vcmp.ge.s32.totalorder %v463_v19, 256 }
  0x77   : > { %v1023_v43 = vadd.s32 4294967040, %v466_v27  ;;  %vm482_vm9 = vcmp.ge.s32.totalorder %v466_v27, 256 }
  0x79   : > { %v1539_v55 = vsel %vm482_vm9, %v1023_v43, %v466_v27  ;;  %vm642_vm9 = vcmp.eq.s32.totalorder %v1387_v36, %v1466_v9 }
  0x7b   : > { %1089 = vmatmul.mubr.bf16.gmra.mrb[8].mxu0 %v1157_v20  ;;  %1097 = vmatmul.mubr.bf16.gmra.mrb[8].mxu1 %v1158_v21  ;;  %v1485_v20 = vadd.s32 %v1374_v28, %v434_v10  ;;  %v1492_v21 = vadd.s32 %v1374_v28, %v435_v11  ;;  %v1020_v28 = vadd.s32 4294967040, %v463_v19 }
  0x7c   : > { %1090 = vmatprep.mubr.bf16.mxu0 %v1159_v22  ;;  %1098 = vmatprep.mubr.bf16.mxu1 %v1160_v23 }
  0x7d   : > { %v467_v32 = vadd.s32 128, %v1485_v20  ;;  %v468_v33 = vadd.s32 128, %v1492_v21  ;;  %v1523_v44 = vsel %vm479_vm13, %v1020_v28, %v463_v19 }
  0x7e   : > { %vm529_vm13 = vcmp.eq.s32.totalorder %v1382_v31, %v1523_v44  ;;  %vm530_vm3 = vcmp.eq.s32.totalorder %v1387_v36, %v1523_v44 }
  0x7f   : > { %v1024_v45 = vadd.s32 4294967040, %v467_v32  ;;  %vm483_vm10 = vcmp.ge.s32.totalorder %v467_v32, 256  ;;  %v1025_v46 = vadd.s32 4294967040, %v468_v33  ;;  %vm484_vm2 = vcmp.ge.s32.totalorder %v468_v33, 256 }
  0x81   : > { %v1555_v0 = vsel %vm483_vm10, %v1024_v45, %v467_v32  ;;  %v1565_v8 = vsel %vm484_vm2, %v1025_v46, %v468_v33  ;;  %vm1958_vm10 = vcmp.eq.s32.totalorder %v1382_v31, %v1461_v6  ;;  %vm644_vm2 = vcmp.eq.s32.totalorder %v1387_v36, %v1474_v15 }
  0x83   : > { %1091 = vmatmul.mubr.bf16.gmra.mrb[12].mxu0 %v1159_v22  ;;  %1099 = vmatmul.mubr.bf16.gmra.mrb[12].mxu1 %v1160_v23  ;;  %v1496_v22 = vsel %vm486_vm5, %v1027_v13, %v470_v4  ;;  %v1018_v23 = vadd.s32 4294967040, %v461_v14  ;;  %vm542_vm5 = vcmp.eq.s32.totalorder %v1387_v36, %v1470_v12 }
  0x85   : > { %v509_v34 = vsel %vm477_vm1, %v1018_v23, %v461_v14  ;;  %vm481_vm1 = vcmp.ge.s32.totalorder %v465_v26, 256 }
  0x86   : > { %vm526_vm7 = vcmp.eq.s32.totalorder %v1387_v36, %v509_v34  ;;  %v1537_v54 = vsel %vm481_vm1, %v1022_v40, %v465_v26  ;;  %vm1960_vm1 = vcmp.eq.s32.totalorder %v1382_v31, %v1496_v22 }
 0x13e   : > { %v345_v51 = vpop.f32.mrb[0].mxu0  ;;  %v385_v52 = vpop.f32.mrb[0].mxu1 }
 0x13f   : > { %v669_v57 = vsel %vm637_vm6, -1e+30, %v345_v51  ;;  %v573_v59 = vsel %vm541_vm11, %v385_v52, 0.0  ;;  %v685_v61 = vsel %vm653_vm12, -1e+30, %v385_v52  ;;  %v347_v62 = vpop.f32.mrb[1].mxu0  ;;  %vm531_vm6 = vcmp.eq.s32.totalorder %v1382_v31, %v1531_v49 }
 0x140   : > { %v1034_v1 = vadd.f32 -2.0, %v669_v57  ;;  %v1050_v3 = vadd.f32 -2.0, %v685_v61  ;;  %v670_v4 = vsel %vm638_vm0, -1e+30, %v347_v62  ;;  %v387_v5 = vpop.f32.mrb[1].mxu1  ;;  %v349_v7 = vpop.f32.mrb[2].mxu0  ;;  %vm643_vm11 = vcmp.eq.s32.totalorder %v1382_v31, %v1474_v15 }
 0x141   : > { %v1035_v10 = vadd.f32 -2.0, %v670_v4  ;;  %v574_v11 = vsel %vm542_vm5, %v387_v5, 0.0  ;;  %v686_v2 = vsel %vm654_vm14, -1e+30, %v387_v5  ;;  %v671_v13 = vsel %vm1958_vm10, -1e+30, %v349_v7 }
 0x142   : > { %vm532_vm0 = vcmp.eq.s32.totalorder %v1387_v36, %v1531_v49  ;;  %v733_v14 = vmul.f32 1.442695, %v1034_v1  ;;  %v765_v16 = vmul.f32 1.442695, %v1050_v3  ;;  %v1051_v19 = vadd.f32 -2.0, %v686_v2  ;;  %v389_v60 = vpop.f32.mrb[2].mxu1 }
 0x143   : > { %v1036_v23 = vadd.f32 -2.0, %v671_v13  ;;  %vm546_vm12 = vcmp.eq.s32.totalorder %v1387_v36, %v1389_v37  ;;  %v735_v12 = vmul.f32 1.442695, %v1035_v10  ;;  %v351_v24 = vpop.f32.mrb[3].mxu0  ;;  %vm1959_vm14 = vcmp.eq.s32.totalorder %v1382_v31, %v509_v34  ;;  %v391_v35 = vpop.f32.mrb[3].mxu1 }
 0x144   : > { %v557_v25 = vsel %vm1959_vm14, %v345_v51, 0.0  ;;  %v558_v26 = vsel %vm526_vm7, %v347_v62, 0.0  ;;  %v1588_v27 = vadd.f32 %v574_v11, %v573_v59  ;;  %1161 = vpow2.f32 %v733_v14 }
 0x145   : > { %v767_v28 = vmul.f32 1.442695, %v1051_v19  ;;  %v737_v32 = vmul.f32 1.442695, %v1036_v23  ;;  %v1593_v33 = vsel %vm1960_vm1, %v389_v60, 0.0  ;;  %vm658_vm10 = vcmp.eq.s32.totalorder %v1387_v36, %v1377_v29 }
 0x146   : > { %1163 = vpow2.f32 %v765_v16  ;;  %vm1961_vm7 = vcmp.eq.s32.totalorder %v1382_v31, %v1450_v63  ;;  %vm1962_vm14 = vcmp.eq.s32.totalorder %v1387_v36, %v1461_v6  ;;  %vm1963_vm5 = vcmp.eq.s32.totalorder %v1387_v36, %v1496_v22  ;;  %v355_v52 = vpop.f32.mrb[4].mxu0  ;;  %v395_v57 = vpop.f32.mrb[4].mxu1 }
 0x147   : > { %v687_v34 = vsel %vm1961_vm7, -1e+30, %v389_v60  ;;  %v672_v40 = vsel %vm1962_vm14, -1e+30, %v351_v24  ;;  %v1606_v43 = vsel %vm1963_vm5, %v391_v35, 0.0  ;;  %1165 = vpow2.f32 %v735_v12  ;;  %v357_v61 = vpop.f32.mrb[5].mxu0 }
 0x148   : > { %v1052_v45 = vadd.f32 -2.0, %v687_v34  ;;  %v1037_v46 = vadd.f32 -2.0, %v672_v40  ;;  %vm1964_vm1 = vcmp.eq.s32.totalorder %v1387_v36, %v1450_v63  ;;  %vm659_vm7 = vcmp.eq.s32.totalorder %v1382_v31, %v1380_v30  ;;  %v397_v62 = vpop.f32.mrb[5].mxu1  ;;  %v359_v4 = vpop.f32.mrb[6].mxu0 }
 0x149   : > { %v688_v51 = vsel %vm1964_vm1, -1e+30, %v391_v35  ;;  %vm533_vm14 = vcmp.eq.s32.totalorder %v1382_v31, %v1537_v54  ;;  %1167 = vpow2.f32 %v767_v28  ;;  %v589_v22 = vadd.f32 %v558_v26, %v557_v25  ;;  %v361_v2 = vpop.f32.mrb[7].mxu0  ;;  %v399_v16 = vpop.f32.mrb[6].mxu1 }
 0x14a   : > { %v1053_v6 = vadd.f32 -2.0, %v688_v51  ;;  %v559_v59 = vsel %vm527_vm15, %v349_v7, 0.0  ;;  %vm645_vm5 = vcmp.eq.s32.totalorder %v1382_v31, %v1478_v17  ;;  %1169 = vpow2.f32 %v737_v32  ;;  %v401_v23 = vpop.f32.mrb[7].mxu1 }
 0x14b   : > { %v769_v63 = vmul.f32 1.442695, %v1052_v45  ;;  %v739_v1 = vmul.f32 1.442695, %v1037_v46  ;;  %v560_v3 = vsel %vm528_vm4, %v351_v24, 0.0  ;;  %vm660_vm1 = vcmp.eq.s32.totalorder %v1387_v36, %v1380_v30  ;;  %590 = vadd.xlane.f32.xlu0 %v589_v22 }
 0x14c   : > { %v771_v5 = vmul.f32 1.442695, %v1053_v6  ;;  %v592_v10 = vadd.f32 %v560_v3, %v559_v59  ;;  %v561_v7 = vsel %vm529_vm13, %v355_v52, 0.0  ;;  %v673_v11 = vsel %vm641_vm8, -1e+30, %v355_v52 }
 0x14d   : > { %vm534_vm15 = vcmp.eq.s32.totalorder %v1387_v36, %v1537_v54  ;;  %1171 = vpow2.f32 %v769_v63  ;;  %v1038_v39 = vadd.f32 -2.0, %v673_v11  ;;  %v562_v13 = vsel %vm530_vm3, %v357_v61, 0.0 }
 0x14e   : > { %v674_v14 = vsel %vm642_vm9, -1e+30, %v357_v61  ;;  %vm646_vm4 = vcmp.eq.s32.totalorder %v1387_v36, %v1478_v17  ;;  %vm535_vm8 = vcmp.eq.s32.totalorder %v1382_v31, %v1539_v55  ;;  %vm536_vm13 = vcmp.eq.s32.totalorder %v1387_v36, %v1539_v55  ;;  %593 = vadd.xlane.f32.xlu1 %v592_v10  ;;  %v1671_v49 = vpop.eup %1161  ;;  %v365_v40 = vpop.f32.mrb[8].mxu0 }
 0x14f   : > { %1173 = vpow2.f32 %v739_v1  ;;  %v1039_v19 = vadd.f32 -2.0, %v674_v14  ;;  %v563_v44 = vsel %vm531_vm6, %v359_v4, 0.0  ;;  %v675_v9 = vsel %vm643_vm11, -1e+30, %v359_v4  ;;  %v367_v52 = vpop.f32.mrb[9].mxu0  ;;  %v1683_v6 = vpop.f32.mrb[8].mxu1 }
 0x150   : > { %vm647_vm3 = vcmp.eq.s32.totalorder %v1382_v31, %v1481_v18  ;;  %1175 = vpow2.f32 %v771_v5  ;;  %v741_v12 = vmul.f32 1.442695, %v1038_v39  ;;  %v1040_v60 = vadd.f32 -2.0, %v675_v9  ;;  %v1678_v45 = vpop.eup %1163  ;;  %v369_v63 = vpop.f32.mrb[10].mxu0 }
 0x151   : > { %v564_v24 = vsel %vm532_vm0, %v361_v2, 0.0  ;;  %vm648_vm9 = vcmp.eq.s32.totalorder %v1387_v36, %v1481_v18  ;;  %v743_v25 = vmul.f32 1.442695, %v1039_v19  ;;  %v676_v26 = vsel %vm644_vm2, -1e+30, %v361_v2  ;;  %v1166_v22 = vpop.eup %1165  ;;  %v1690_v1 = vpop.f32.mrb[9].mxu1 }
 0x152   : > { %vm1965_vm6 = vcmp.eq.s32.totalorder %v1382_v31, %v1389_v37  ;;  %v1669_v32 = vsel %vm546_vm12, %v397_v62, 0.0  ;;  %1177 = vpow2.f32 %v741_v12  ;;  %v745_v35 = vmul.f32 1.442695, %v1040_v60  ;;  %v371_v10 = vpop.f32.mrb[11].mxu0 }
 0x153   : > { %v1664_v28 = vsel %vm1965_vm6, %v395_v57, 0.0  ;;  %v1041_v34 = vadd.f32 -2.0, %v676_v26  ;;  %vm1966_vm11 = vcmp.eq.s32.totalorder %v1382_v31, %v1377_v29  ;;  %vm661_vm0 = vcmp.eq.s32.totalorder %v1382_v31, %v1402_v41  ;;  %v1168_v29 = vpop.eup %1167 }
 0x154   : > { %v689_v15 = vsel %vm1966_vm11, -1e+30, %v395_v57  ;;  %1179 = vpow2.f32 %v743_v25  ;;  %v690_v37 = vsel %vm658_vm10, -1e+30, %v397_v62  ;;  %v595_v51 = vadd.f32 %v562_v13, %v561_v7  ;;  %v1704_v7 = vpop.eup %1169  ;;  %v1709_v13 = vpop.f32.mrb[10].mxu1 }
 0x155   : > { %v1054_v46 = vadd.f32 -2.0, %v689_v15  ;;  %1181 = vpow2.f32 %v745_v35  ;;  %v747_v59 = vmul.f32 1.442695, %v1041_v34  ;;  %v1055_v57 = vadd.f32 -2.0, %v690_v37 }
 0x156   : > { %vm1967_vm2 = vcmp.eq.s32.totalorder %v1382_v31, %v1393_v38  ;;  %vm662_vm12 = vcmp.eq.s32.totalorder %v1387_v36, %v1402_v41  ;;  %596 = vadd.xlane.f32.xlu0 %v595_v51  ;;  %v691_v3 = vsel %vm659_vm7, -1e+30, %v399_v16  ;;  %v598_v4 = vadd.f32 %v564_v24, %v563_v44  ;;  %v1721_v44 = vpop.f32.mrb[11].mxu1  ;;  %v375_v15 = vpop.f32.mrb[12].mxu0 }
 0x157   : > { %v1688_v61 = vsel %vm1967_vm2, %v399_v16, 0.0  ;;  %v773_v62 = vmul.f32 1.442695, %v1054_v46  ;;  %v1700_v5 = vsel %vm533_vm14, %v365_v40, 0.0  ;;  %vm663_vm10 = vcmp.eq.s32.totalorder %v1382_v31, %v1405_v42  ;;  %v1172_v9 = vpop.eup %1171  ;;  %v377_v37 = vpop.f32.mrb[13].mxu0 }
 0x158   : > { %1183 = vpow2.f32 %v747_v59  ;;  %v775_v11 = vmul.f32 1.442695, %v1055_v57  ;;  %v1056_v2 = vadd.f32 -2.0, %v691_v3  ;;  %v677_v39 = vsel %vm645_vm5, -1e+30, %v365_v40  ;;  %599 = vadd.xlane.f32.xlu1 %v598_v4  ;;  %v1758_v51 = vpop.f32.mrb[12].mxu1 }
 0x159   : > { %vm664_vm7 = vcmp.eq.s32.totalorder %v1387_v36, %v1405_v42  ;;  %1185 = vpow2.f32 %v773_v62  ;;  %v1042_v14 = vadd.f32 -2.0, %v677_v39  ;;  %vm1968_vm14 = vcmp.eq.s32.totalorder %v1387_v36, %v1393_v38  ;;  %v1734_v30 = vpop.eup %1173  ;;  %v379_v62 = vpop.f32.mrb[14].mxu0 }
 0x15a   : > { %v1716_v16 = vsel %vm1968_vm14, %v401_v23, 0.0  ;;  %v692_v19 = vsel %vm660_vm1, -1e+30, %v401_v23  ;;  %vm537_vm5 = vcmp.eq.s32.totalorder %v1382_v31, %v1555_v0  ;;  %1187 = vpow2.f32 %v775_v11  ;;  %v1176_v26 = vpop.eup %1175  ;;  %v1764_v3 = vpop.f32.mrb[13].mxu1 }
 0x15b   : > { %v777_v12 = vmul.f32 1.442695, %v1056_v2  ;;  %v1057_v60 = vadd.f32 -2.0, %v692_v19  ;;  %v1728_v24 = vsel %vm534_vm15, %v367_v52, 0.0  ;;  %vm649_vm6 = vcmp.eq.s32.totalorder %v1382_v31, %v1485_v20  ;;  %v381_v11 = vpop.f32.mrb[15].mxu0 }
 0x15c   : > { %vm538_vm1 = vcmp.eq.s32.totalorder %v1387_v36, %v1555_v0  ;;  %v749_v38 = vmul.f32 1.442695, %v1042_v14  ;;  %v678_v23 = vsel %vm646_vm4, -1e+30, %v367_v52  ;;  %v567_v25 = vsel %vm535_vm8, %v369_v63, 0.0  ;;  %v1178_v52 = vpop.eup %1177 }
 0x15d   : > { %v568_v54 = vsel %vm536_vm13, %v371_v10, 0.0  ;;  %vm650_vm15 = vcmp.eq.s32.totalorder %v1387_v36, %v1485_v20  ;;  %1189 = vpow2.f32 %v777_v12  ;;  %v779_v35 = vmul.f32 1.442695, %v1057_v60 }
 0x15e   : > { %v1043_v34 = vadd.f32 -2.0, %v678_v23  ;;  %v679_v17 = vsel %vm647_vm3, -1e+30, %v369_v63  ;;  %vm539_vm4 = vcmp.eq.s32.totalorder %v1382_v31, %v1565_v8  ;;  %vm651_vm8 = vcmp.eq.s32.totalorder %v1382_v31, %v1492_v21  ;;  %v1180_v18 = vpop.eup %1179 }
 0x15f   : > { %1191 = vpow2.f32 %v749_v38  ;;  %v1044_v55 = vadd.f32 -2.0, %v679_v17  ;;  %v680_v40 = vsel %vm648_vm9, -1e+30, %v371_v10  ;;  %v797_v46 = vadd.f32 %v1166_v22, %v1671_v49  ;;  %v1779_v2 = vpop.eup %1181 }
 0x160   : > { %1193 = vpow2.f32 %v779_v35  ;;  %v751_v59 = vmul.f32 1.442695, %v1043_v34  ;;  %v1045_v57 = vadd.f32 -2.0, %v680_v40  ;;  %v824_v63 = vadd.f32 %v1176_v26, %v1172_v9 }
 0x161   : > { %vm540_vm13 = vcmp.eq.s32.totalorder %v1387_v36, %v1565_v8  ;;  %vm652_vm3 = vcmp.eq.s32.totalorder %v1387_v36, %v1492_v21  ;;  %v753_v4 = vmul.f32 1.442695, %v1044_v55  ;;  %798 = vadd.xlane.f32.xlu0 %v797_v46  ;;  %v821_v49 = vadd.f32 %v1168_v29, %v1678_v45 }
 0x162   : > { %vm1969_vm9 = vcmp.eq.s32.totalorder %v1382_v31, %v1409_v47  ;;  %v693_v10 = vsel %vm661_vm0, -1e+30, %v1683_v6  ;;  %vm665_vm11 = vcmp.eq.s32.totalorder %v1382_v31, %v1423_v50  ;;  %1195 = vpow2.f32 %v751_v59  ;;  %825 = vadd.xlane.f32.xlu1 %v824_v63  ;;  %v1184_v12 = vpop.eup %1183 }
 0x163   : > { %v1771_v22 = vsel %vm1969_vm9, %v1683_v6, 0.0  ;;  %v755_v39 = vmul.f32 1.442695, %v1045_v57  ;;  %v1058_v45 = vadd.f32 -2.0, %v693_v10  ;;  %vm1970_vm2 = vcmp.eq.s32.totalorder %v1387_v36, %v1409_v47  ;;  %v1789_v6 = vpop.f32.mrb[14].mxu1  ;;  %v1809_v41 = vpop.eup %1185 }
 0x164   : > { %v1785_v29 = vsel %vm1970_vm2, %v1690_v1, 0.0  ;;  %vm666_vm14 = vcmp.eq.s32.totalorder %v1387_v36, %v1423_v50  ;;  %1197 = vpow2.f32 %v753_v4  ;;  %v694_v14 = vsel %vm662_vm12, -1e+30, %v1690_v1  ;;  %v1801_v47 = vpop.f32.mrb[15].mxu1  ;;  %v1188_v26 = vpop.eup %1187 }
 0x165   : > { %v604_v19 = vadd.f32 %v568_v54, %v567_v25  ;;  %vm1971_vm0 = vcmp.eq.s32.totalorder %v1382_v31, %v1411_v48  ;;  %1199 = vpow2.f32 %v755_v39  ;;  %v781_v60 = vmul.f32 1.442695, %v1058_v45  ;;  %822 = vadd.xlane.f32.xlu0 %v821_v49 }
 0x166   : > { %v1799_v9 = vsel %vm1971_vm0, %v1709_v13, 0.0  ;;  %v1059_v38 = vadd.f32 -2.0, %v694_v14  ;;  %v695_v23 = vsel %vm663_vm10, -1e+30, %v1709_v13  ;;  %vm667_vm12 = vcmp.eq.s32.totalorder %v1382_v31, %v1428_v53 }
 0x167   : > { %v1060_v1 = vadd.f32 -2.0, %v695_v23  ;;  %vm1972_vm9 = vcmp.eq.s32.totalorder %v1387_v36, %v1411_v48  ;;  %v696_v54 = vsel %vm664_vm7, -1e+30, %v1721_v44  ;;  %v601_v13 = vadd.f32 %v1728_v24, %v1700_v5  ;;  %605 = vadd.xlane.f32.xlu1 %v604_v19  ;;  %v1190_v24 = vpop.eup %1189 }
 0x168   : > { %v1815_v25 = vsel %vm1972_vm9, %v1721_v44, 0.0  ;;  %vm668_vm10 = vcmp.eq.s32.totalorder %v1387_v36, %v1428_v53  ;;  %1201 = vpow2.f32 %v781_v60  ;;  %v783_v35 = vmul.f32 1.442695, %v1059_v38 }
 0x169   : > { %v1061_v34 = vadd.f32 -2.0, %v696_v54  ;;  %v569_v48 = vsel %vm537_vm5, %v375_v15, 0.0  ;;  %v785_v17 = vmul.f32 1.442695, %v1060_v1  ;;  %v681_v42 = vsel %vm649_vm6, -1e+30, %v375_v15  ;;  %v1192_v59 = vpop.eup %1191  ;;  %602 = vadd.xlane.f32.xlu0 %v601_v13 }
 0x16a   : > { %v803_v44 = vadd.f32 %v1180_v18, %v1178_v52  ;;  %v570_v5 = vsel %vm538_vm1, %v377_v37, 0.0  ;;  %1203 = vpow2.f32 %v783_v35  ;;  %v1046_v40 = vadd.f32 -2.0, %v681_v42  ;;  %v1194_v52 = vpop.eup %1193 }
 0x16b   : > { %v787_v55 = vmul.f32 1.442695, %v1061_v34  ;;  %v682_v46 = vsel %vm650_vm15, -1e+30, %v377_v37  ;;  %1205 = vpow2.f32 %v785_v17  ;;  %v571_v15 = vsel %vm539_vm4, %v379_v62, 0.0 }
 0x16c   : > { %v1047_v57 = vadd.f32 -2.0, %v682_v46  ;;  %v683_v0 = vsel %vm651_vm8, -1e+30, %v379_v62  ;;  %v757_v63 = vmul.f32 1.442695, %v1046_v40  ;;  %804 = vadd.xlane.f32.xlu1 %v803_v44  ;;  %v800_v20 = vadd.f32 %v1734_v30, %v1704_v7  ;;  %v1196_v10 = vpop.eup %1195 }
 0x16d   : > { %1207 = vpow2.f32 %v787_v55  ;;  %v1048_v18 = vadd.f32 -2.0, %v683_v0  ;;  %v572_v4 = vsel %vm540_vm13, %v381_v11, 0.0  ;;  %v684_v49 = vsel %vm652_vm3, -1e+30, %v381_v11 }
 0x16e   : > { %v759_v37 = vmul.f32 1.442695, %v1047_v57  ;;  %vm1973_vm7 = vcmp.eq.s32.totalorder %v1382_v31, %v1431_v56  ;;  %1209 = vpow2.f32 %v757_v63  ;;  %v1049_v45 = vadd.f32 -2.0, %v684_v49  ;;  %v1198_v8 = vpop.eup %1197  ;;  %801 = vadd.xlane.f32.xlu0 %v800_v20 }
 0x16f   : > { %v585_v62 = vsel %vm1973_vm7, %v1758_v51, 0.0  ;;  %v761_v39 = vmul.f32 1.442695, %v1048_v18  ;;  %v697_v7 = vsel %vm665_vm11, -1e+30, %v1758_v51  ;;  %vm1974_vm5 = vcmp.eq.s32.totalorder %v1387_v36, %v1431_v56  ;;  %v1200_v14 = vpop.eup %1199 }
 0x170   : > { %1211 = vpow2.f32 %v759_v37  ;;  %v1062_v30 = vadd.f32 -2.0, %v697_v7  ;;  %v586_v21 = vsel %vm1974_vm5, %v1764_v3, 0.0  ;;  %v698_v11 = vsel %vm666_vm14, -1e+30, %v1764_v3 }
 0x171   : > { %1213 = vpow2.f32 %v761_v39  ;;  %v763_v19 = vmul.f32 1.442695, %v1049_v45  ;;  %v1063_v60 = vadd.f32 -2.0, %v698_v11  ;;  %v806_v51 = vadd.f32 %v1184_v12, %v1779_v2 }
 0x172   : > { %v789_v38 = vmul.f32 1.442695, %v1062_v30  ;;  %vm1975_vm6 = vcmp.eq.s32.totalorder %v1382_v31, %v1437_v58  ;;  %v699_v56 = vsel %vm667_vm12, -1e+30, %v1789_v6  ;;  %vm1976_vm1 = vcmp.eq.s32.totalorder %v1387_v36, %v1437_v58  ;;  %v1202_v3 = vpop.eup %1201 }
 0x173   : > { %v587_v23 = vsel %vm1975_vm6, %v1789_v6, 0.0  ;;  %v588_v50 = vsel %vm1976_vm1, %v1801_v47, 0.0  ;;  %1215 = vpow2.f32 %v763_v19  ;;  %v791_v1 = vmul.f32 1.442695, %v1063_v60  ;;  %807 = vadd.xlane.f32.xlu1 %v806_v51 }
 0x174   : > { %v1064_v2 = vadd.f32 -2.0, %v699_v56  ;;  %v700_v12 = vsel %vm668_vm10, -1e+30, %v1801_v47  ;;  %1217 = vpow2.f32 %v789_v38  ;;  %v827_v31 = vadd.f32 %v1188_v26, %v1809_v41  ;;  %v1204_v13 = vpop.eup %1203 }
 0x175   : > { %v1065_v54 = vadd.f32 -2.0, %v700_v12  ;;  %v830_v6 = vadd.f32 %v1194_v52, %v1190_v24  ;;  %1219 = vpow2.f32 %v791_v1  ;;  %v607_v58 = vadd.f32 %v570_v5, %v569_v48  ;;  %v1206_v17 = vpop.eup %1205 }
 0x176   : > { %v793_v35 = vmul.f32 1.442695, %v1064_v2  ;;  %v610_v34 = vadd.f32 %v572_v4, %v571_v15  ;;  %828 = vadd.xlane.f32.xlu0 %v827_v31  ;;  %v809_v44 = vadd.f32 %v1196_v10, %v1192_v59  ;;  %v812_v55 = vadd.f32 %v1200_v14, %v1198_v8 }
 0x177   : > { %v795_v42 = vmul.f32 1.442695, %v1065_v54  ;;  %v833_v40 = vadd.f32 %v1204_v13, %v1202_v3  ;;  %v1208_v46 = vpop.eup %1207  ;;  %831 = vadd.xlane.f32.xlu1 %v830_v6  ;;  %v616_v36 = vadd.f32 %v1606_v43, %v1593_v33  ;;  %v619_v53 = vadd.f32 %v1669_v32, %v1664_v28 }
 0x178   : > { %1221 = vpow2.f32 %v793_v35  ;;  %v622_v47 = vadd.f32 %v1716_v16, %v1688_v61  ;;  %v836_v41 = vadd.f32 %v1208_v46, %v1206_v17  ;;  %v625_v26 = vadd.f32 %v1785_v29, %v1771_v22  ;;  %v1210_v5 = vpop.eup %1209 }
 0x179   : > { %1223 = vpow2.f32 %v795_v42  ;;  %v628_v48 = vadd.f32 %v1815_v25, %v1799_v9  ;;  %v631_v24 = vadd.f32 %v586_v21, %v585_v62  ;;  %v634_v59 = vadd.f32 %v588_v50, %v587_v23 }
 0x17a   : > { %v1212_v57 = vpop.eup %1211  ;;  %608 = vadd.xlane.f32.xlu0 %v607_v58  ;;  %vm909_vm15 = vcmask 7168  }
 0x17b   : > { %v1214_v33 = vpop.eup %1213  ;;  %611 = vadd.xlane.f32.xlu1 %v610_v34  ;;  %v815_v43 = vadd.f32 %v1212_v57, %v1210_v5 }
 0x17d   : > { %v1216_v28 = vpop.eup %1215 }
 0x17e   : > { %v1218_v32 = vpop.eup %1217  ;;  %810 = vadd.xlane.f32.xlu0 %v809_v44  ;;  %v818_v61 = vadd.f32 %v1216_v28, %v1214_v33 }
 0x17f   : > { %v1220_v16 = vpop.eup %1219  ;;  %813 = vadd.xlane.f32.xlu1 %v812_v55 }
 0x180   : > { %v839_v15 = vadd.f32 %v1220_v16, %v1218_v32 }
 0x182   : > { %v1222_v0 = vpop.eup %1221  ;;  %834 = vadd.xlane.f32.xlu0 %v833_v40 }
 0x183   : > { %v1224_v22 = vpop.eup %1223  ;;  %837 = vadd.xlane.f32.xlu1 %v836_v41 }
 0x184   : > { %v842_v29 = vadd.f32 %v1224_v22, %v1222_v0 }
 0x186   : > { %816 = vadd.xlane.f32.xlu0 %v815_v43 }
 0x187   : > { %819 = vadd.xlane.f32.xlu1 %v818_v61 }
 0x18a   : > { %840 = vadd.xlane.f32.xlu0 %v839_v15 }
 0x18b   : > { %843 = vadd.xlane.f32.xlu1 %v842_v29 }
 0x18e   : > { %614 = vadd.xlane.f32.xlu0 %v1588_v27 }
 0x18f   : > { %617 = vadd.xlane.f32.xlu1 %v616_v36 }
 0x192   : > { %620 = vadd.xlane.f32.xlu0 %v619_v53 }
 0x193   : > { %623 = vadd.xlane.f32.xlu1 %v622_v47 }
 0x196   : > { %626 = vadd.xlane.f32.xlu0 %v625_v26 }
 0x197   : > { %629 = vadd.xlane.f32.xlu1 %v628_v48 }
 0x19a   : > { %632 = vadd.xlane.f32.xlu0 %v631_v24 }
 0x19b   : > { %635 = vadd.xlane.f32.xlu1 %v634_v59 }
 0x1d8   : > { %v591_v9 = vpop.xlane.xlu0 %590 }
 0x1db   : > { %v594_v25 = vpop.xlane.xlu1 %593 }
 0x1e3   : > { %v597_v52 = vpop.xlane.xlu0 %596 }
 0x1e5   : > { %v600_v63 = vpop.xlane.xlu1 %599 }
 0x1ee   : > { %v799_v18 = vpop.xlane.xlu0 %798 }
 0x1ef   : > { %1225 = vlog2.f32 %v799_v18  ;;  %v826_v20 = vpop.xlane.xlu1 %825 }
 0x1f2   : > { %v823_v37 = vpop.xlane.xlu0 %822 }
 0x1f4   : > { %v1897_v4 = vpop.xlane.xlu1 %605 }
 0x1f6   : > { %v1899_v27 = vpop.xlane.xlu0 %602 }
 0x1f9   : > { %v805_v49 = vpop.xlane.xlu1 %804  ;;  %v1226_v62 = vpop.eup %1225 }
 0x1fa   : > { %1227 = vlog2.f32 %v805_v49  ;;  %v846_v10 = vmul.f32 0.6931472, %v1226_v62 }
 0x1fb   : > { %v802_v39 = vpop.xlane.xlu0 %801 }
 0x1fc   : > { %1229 = vlog2.f32 %v802_v39  ;;  %v877_v45 = vadd.f32 2.0, %v846_v10 }
 0x1fe   : > { %v893_v8 = vsub.f32 %v877_v45, %v591_v9 }
 0x200   : > { %v808_v7 = vpop.xlane.xlu1 %807  ;;  %910 = vst.msk [vmem:[%s1904_s3] sm:$0xff] %vm909_vm15, %v893_v8 }
 0x201   : > { %1231 = vlog2.f32 %v808_v7 }
 0x202   : > { %1233 = vlog2.f32 %v823_v37 }
 0x203   : > { %v829_v30 = vpop.xlane.xlu0 %828  ;;  %1235 = vlog2.f32 %v826_v20 }
 0x204   : > { %v832_v21 = vpop.xlane.xlu1 %831  ;;  %v1228_v11 = vpop.eup %1227  ;;  %1237 = vlog2.f32 %v829_v30 }
 0x205   : > { %v850_v14 = vmul.f32 0.6931472, %v1228_v11 }
 0x206   : > { %v1230_v60 = vpop.eup %1229 }
 0x207   : > { %v1908_v19 = vpop.xlane.xlu0 %608  ;;  %v879_v51 = vadd.f32 2.0, %v850_v14  ;;  %v848_v23 = vmul.f32 0.6931472, %v1230_v60 }
 0x208   : > { %v1910_v38 = vpop.xlane.xlu1 %611 }
 0x209   : > { %v895_v56 = vsub.f32 %v879_v51, %v597_v52  ;;  %v878_v3 = vadd.f32 2.0, %v848_v23 }
 0x20b   : > { %v1232_v50 = vpop.eup %1231  ;;  %v811_v1 = vpop.xlane.xlu0 %810  ;;  %912 = vst.msk [vmem:[%s1904_s3 + $0x10] sm:$0xff] %vm909_vm15, %v895_v56  ;;  %v894_v54 = vsub.f32 %v878_v3, %v594_v25 }
 0x20c   : > { %v852_v2 = vmul.f32 0.6931472, %v1232_v50  ;;  %1239 = vlog2.f32 %v811_v1  ;;  %v814_v12 = vpop.xlane.xlu1 %813  ;;  %v1234_v58 = vpop.eup %1233 }
 0x20d   : > { %1241 = vlog2.f32 %v814_v12  ;;  %911 = vst.msk [vmem:[%s1904_s3 + $0x8] sm:$0xff] %vm909_vm15, %v894_v54  ;;  %v1236_v17 = vpop.eup %1235  ;;  %v862_v40 = vmul.f32 0.6931472, %v1234_v58 }
 0x20e   : > { %v880_v31 = vadd.f32 2.0, %v852_v2  ;;  %1243 = vlog2.f32 %v832_v21  ;;  %v1238_v44 = vpop.eup %1237  ;;  %v864_v47 = vmul.f32 0.6931472, %v1236_v17 }
 0x20f   : > { %v835_v6 = vpop.xlane.xlu0 %834  ;;  %v885_v59 = vadd.f32 2.0, %v862_v40  ;;  %v866_v57 = vmul.f32 0.6931472, %v1238_v44 }
 0x210   : > { %v896_v13 = vsub.f32 %v880_v31, %v600_v63  ;;  %v838_v35 = vpop.xlane.xlu1 %837  ;;  %1245 = vlog2.f32 %v835_v6  ;;  %v886_v32 = vadd.f32 2.0, %v864_v47 }
 0x211   : > { %1247 = vlog2.f32 %v838_v35  ;;  %v887_v25 = vadd.f32 2.0, %v866_v57 }
 0x212   : > { %913 = vst.msk [vmem:[%s1904_s3 + $0x18] sm:$0xff] %vm909_vm15, %v896_v13 }
 0x213   : > { %v817_v34 = vpop.xlane.xlu0 %816 }
 0x214   : > { %1249 = vlog2.f32 %v817_v34  ;;  %v820_v42 = vpop.xlane.xlu1 %819 }
 0x215   : > { %1251 = vlog2.f32 %v820_v42 }
 0x216   : > { %v1240_v55 = vpop.eup %1239 }
 0x217   : > { %v1242_v46 = vpop.eup %1241  ;;  %v854_v36 = vmul.f32 0.6931472, %v1240_v55  ;;  %v841_v53 = vpop.xlane.xlu0 %840 }
 0x218   : > { %v1244_v41 = vpop.eup %1243  ;;  %v856_v26 = vmul.f32 0.6931472, %v1242_v46  ;;  %1253 = vlog2.f32 %v841_v53  ;;  %v844_v48 = vpop.xlane.xlu1 %843 }
 0x219   : > { %v881_v5 = vadd.f32 2.0, %v854_v36  ;;  %1255 = vlog2.f32 %v844_v48  ;;  %v868_v61 = vmul.f32 0.6931472, %v1244_v41 }
 0x21a   : > { %v882_v24 = vadd.f32 2.0, %v856_v26  ;;  %v1246_v33 = vpop.eup %1245 }
 0x21b   : > { %v897_v43 = vsub.f32 %v881_v5, %v1899_v27  ;;  %v615_v28 = vpop.xlane.xlu0 %614  ;;  %v1248_v16 = vpop.eup %1247  ;;  %v870_v52 = vmul.f32 0.6931472, %v1246_v33  ;;  %v888_v37 = vadd.f32 2.0, %v868_v61 }
 0x21c   : > { %v898_v15 = vsub.f32 %v882_v24, %v1897_v4  ;;  %v901_v0 = vsub.f32 %v885_v59, %v615_v28  ;;  %v618_v22 = vpop.xlane.xlu1 %617  ;;  %v872_v4 = vmul.f32 0.6931472, %v1248_v16 }
 0x21d   : > { %914 = vst.msk [vmem:[%s1904_s3 + $0x20] sm:$0xff] %vm909_vm15, %v897_v43  ;;  %v902_v29 = vsub.f32 %v886_v32, %v618_v22  ;;  %v889_v8 = vadd.f32 2.0, %v870_v52 }
 0x21e   : > { %v1250_v9 = vpop.eup %1249  ;;  %915 = vst.msk [vmem:[%s1904_s3 + $0x28] sm:$0xff] %vm909_vm15, %v898_v15  ;;  %918 = vst.msk [vmem:[%s1904_s3 + $0x40] sm:$0xff] %vm909_vm15, %v901_v0  ;;  %v890_v14 = vadd.f32 2.0, %v872_v4 }
 0x21f   : > { %v1252_v63 = vpop.eup %1251  ;;  %v858_v18 = vmul.f32 0.6931472, %v1250_v9  ;;  %919 = vst.msk [vmem:[%s1904_s3 + $0x48] sm:$0xff] %vm909_vm15, %v902_v29  ;;  %v621_v20 = vpop.xlane.xlu0 %620 }
 0x220   : > { %v860_v27 = vmul.f32 0.6931472, %v1252_v63  ;;  %v903_v49 = vsub.f32 %v887_v25, %v621_v20  ;;  %v624_v62 = vpop.xlane.xlu1 %623 }
 0x221   : > { %v883_v10 = vadd.f32 2.0, %v858_v18  ;;  %v904_v39 = vsub.f32 %v888_v37, %v624_v62 }
 0x222   : > { %v1254_v45 = vpop.eup %1253  ;;  %v884_v7 = vadd.f32 2.0, %v860_v27  ;;  %920 = vst.msk [vmem:[%s1904_s3 + $0x50] sm:$0xff] %vm909_vm15, %v903_v49 }
 0x223   : > { %v1256_v30 = vpop.eup %1255  ;;  %v899_v21 = vsub.f32 %v883_v10, %v1908_v19  ;;  %921 = vst.msk [vmem:[%s1904_s3 + $0x58] sm:$0xff] %vm909_vm15, %v904_v39  ;;  %v627_v11 = vpop.xlane.xlu0 %626  ;;  %v874_v60 = vmul.f32 0.6931472, %v1254_v45 }
 0x224   : > { %v900_v51 = vsub.f32 %v884_v7, %v1910_v38  ;;  %v905_v23 = vsub.f32 %v889_v8, %v627_v11  ;;  %v630_v56 = vpop.xlane.xlu1 %629  ;;  %v876_v50 = vmul.f32 0.6931472, %v1256_v30 }
 0x225   : > { %916 = vst.msk [vmem:[%s1904_s3 + $0x30] sm:$0xff] %vm909_vm15, %v899_v21  ;;  %v906_v3 = vsub.f32 %v890_v14, %v630_v56  ;;  %v891_v1 = vadd.f32 2.0, %v874_v60 }
 0x226   : > { %917 = vst.msk [vmem:[%s1904_s3 + $0x38] sm:$0xff] %vm909_vm15, %v900_v51  ;;  %922 = vst.msk [vmem:[%s1904_s3 + $0x60] sm:$0xff] %vm909_vm15, %v905_v23  ;;  %v892_v19 = vadd.f32 2.0, %v876_v50 }
 0x227   : > { %923 = vst.msk [vmem:[%s1904_s3 + $0x68] sm:$0xff] %vm909_vm15, %v906_v3  ;;  %v633_v2 = vpop.xlane.xlu0 %632 }
 0x228   : > { %v907_v12 = vsub.f32 %v891_v1, %v633_v2  ;;  %v636_v54 = vpop.xlane.xlu1 %635 }
 0x229   : > { %v908_v31 = vsub.f32 %v892_v19, %v636_v54 }
 0x22a   : > { %924 = vst.msk [vmem:[%s1904_s3 + $0x70] sm:$0xff] %vm909_vm15, %v907_v12 }
 0x22b   : > { %925 = vst.msk [vmem:[%s1904_s3 + $0x78] sm:$0xff] %vm909_vm15, %v908_v31 }
 0x22c PF: > { %s12_s6 = sadd.s32 1, %s1295_s6  }
 0x22d   : > { %p9_p3 = scmp.ge.s32.totalorder %s12_s6, 4  }
 0x22f   :  { %11 = sbr.rel (!%p9_p3) target bundleno = 1 (0x1), region = 57 }
 0x236   :  { %948 = vsyncpa [#allocation3], 1 }
 0x237   :  { %950 = vsyncpa [#allocation3 + $0x1], 1 }

</bundles_post_ra>
